<compile_context>
chip_gen: v7x
topology: tpu7x:2x2x1
jax: 0.10.0
libtpu: 0.0.40
codegen_flags: <defaults>
</compile_context>

<pallas_src>
import functools

import jax
import jax.numpy as jnp
from jax.experimental import pallas as pl
from jax.experimental.pallas import tpu as pltpu


def _attention_kernel(q_ref, k_ref, v_ref, mask_ref,
                      wq_ref, wk_ref, wv_ref,
                      out_ref, *rest,
                      G, L, n_head, d_k, d_v, return_attn):
    """One grid step: G (b,k) slices, fused QKV projection + attention."""
    if return_attn:
        attn_ref, out_slab = rest
    else:
        (out_slab,) = rest

    cd = q_ref.dtype                      # compute dtype (bf16 default)

    # Projections: inputs are already (G*L, d_model) and lane-dense, no
    # in-kernel reshape.  1/temperature is pre-folded into wq on the host.
    qp = jnp.dot(q_ref[...], wq_ref[...], preferred_element_type=jnp.float32)
    kp = jnp.dot(k_ref[...], wk_ref[...], preferred_element_type=jnp.float32)
    vp = jnp.dot(v_ref[...], wv_ref[...], preferred_element_type=jnp.float32)

    masked = mask_ref[...] != 0           # (G, L, L) bool, shared by heads

    # n_head is small & static -> unrolled Python loop; all matmuls inside
    # are batched over the G group elements.  Only one head's (G, L, L)
    # probabilities are live at any time.
    for h in range(n_head):
        qh = qp[:, h * d_k:(h + 1) * d_k].reshape(G, L, d_k).astype(cd)
        kh = kp[:, h * d_k:(h + 1) * d_k].reshape(G, L, d_k).astype(cd)
        vh = vp[:, h * d_v:(h + 1) * d_v].reshape(G, L, d_v).astype(cd)

        # scores already scaled by 1/temperature (folded into wq).
        scores = jnp.einsum('gld,gtd->glt', qh, kh,
                            preferred_element_type=jnp.float32)   # (G, L, L)
        scores = jnp.where(masked, jnp.float32(-1e9), scores)

        # softmax over the last dim, f32; approx reciprocal + 1 Newton step
        # keeps the divide on the (nearly free) EUP slot.
        smax = jnp.max(scores, axis=-1, keepdims=True)
        p = jnp.exp(scores - smax)
        denom = jnp.sum(p, axis=-1, keepdims=True)
        r = pl.reciprocal(denom, approx=True)
        r = r * (2.0 - denom * r)

        if return_attn:
            probs = p * r
            # Per-head store; trailing (L, L) dims are the tiled ones.
            attn_ref[:, h:h + 1] = probs[:, None].astype(attn_ref.dtype)
            ctx = jnp.einsum('glt,gtd->gld', probs.astype(cd), vh,
                             preferred_element_type=jnp.float32)  # (G, L, d_v)
        else:
            # Normalize AFTER the (L x d_v) matmul: (L/d_v)x fewer VPU mults.
            ctx = jnp.einsum('glt,gtd->gld', p.astype(cd), vh,
                             preferred_element_type=jnp.float32)
            ctx = ctx * r

        out_slab[:, :, h * d_v:(h + 1) * d_v] = ctx

    # Single store of the assembled output slab per grid step.
    out_ref[...] = out_slab[...].astype(out_ref.dtype)


def _vmem_capacity_bytes():
    """Physical VMEM per core (generation-aware), with a conservative fallback."""
    cap = 64 * 1024 * 1024                       # v7x per-TC (the smallest)
    try:
        info = pltpu.get_tpu_info()
        c = getattr(info, "vmem_capacity_bytes", None)
        if c:
            cap = int(c)
    except Exception:
        pass
    return cap


def _choose_group_size(BK, L, d_model, n_head, d_k, d_v, return_attn,
                       in_itemsize, w_itemsize, attn_itemsize,
                       vmem_budget_bytes):
    """Pick how many (b, k) slices each grid step processes."""

    def block_bytes(g):
        gl = g * L
        b = 0
        # Double-buffered pipeline tiles.
        b += 2 * 3 * gl * d_model * in_itemsize              # q, k, v
        b += 2 * g * L * L                                   # int8 mask
        b += 2 * gl * n_head * d_v * 4                       # out (f32)
        if return_attn:
            b += 2 * g * n_head * L * L * attn_itemsize      # attn
        # Weights: constant index_map but still double-buffered by default.
        b += 2 * (2 * d_model * n_head * d_k
                  + d_model * n_head * d_v) * w_itemsize
        # Live intermediates (single copy inside the kernel body).
        b += gl * n_head * (2 * d_k + d_v) * 4               # qp, kp, vp (f32)
        b += 4 * g * L * L * 4                               # scores / p temps
        b += gl * n_head * d_v * 4                           # out slab scratch
        b += 2 * gl * d_v * 4                                # ctx temps
        return b

    divisors = [g for g in range(1, BK + 1) if BK % g == 0]
    feasible = [g for g in divisors if block_bytes(g) <= vmem_budget_bytes]
    if not feasible:
        feasible = [1]
    # Keep >= 4 grid steps when possible (2 per TensorCore on v7x so each
    # core still overlaps DMA with compute), else >= 2, else anything.
    pool = feasible
    for min_steps in (4, 2, 1):
        cand = [g for g in feasible if BK // g >= min_steps]
        if cand:
            pool = cand
            break
    # Largest affordable group: big matmul rows amortize per-step overhead
    # and feed the 256-wide MXUs on v6e/v7x.
    return max(pool)


def scaled_dot_product_attention_bias(q, k, v, mask, wq, wk, wv, *,
                                      n_head, d_k, d_v, temperature,
                                      return_attn=True,
                                      compute_dtype=jnp.bfloat16,
                                      attn_dtype=jnp.float32):
    """Forward pass of ScaledDotProductAttention_bias (rotate=False, bin_att=False).

    q, k, v : (B, K, L, d_model) float32
    mask    : (B, K, L, L) bool  (True = masked out)
    wq, wk  : (d_model, n_head*d_k) float32
    wv      : (d_model, n_head*d_v) float32
    returns : out (B, K, L, n_head*d_v) [, attn (B, K, n_head, L, L)]

    compute_dtype: bfloat16 (default) feeds the MXU its native operand dtype
    on v5e/v6e/v7x and halves input DMA; expect ~1e-2-level divergence from
    an f32 reference.  Pass jnp.float32 for near bit-exact numerics.
    attn_dtype: set to jnp.bfloat16 to halve the attn writeback bandwidth.
    """
    B, K, L, d_model = q.shape
    BK = B * K

    in_itemsize = jnp.dtype(compute_dtype).itemsize
    attn_itemsize = jnp.dtype(attn_dtype).itemsize

    cap = _vmem_capacity_bytes()
    vmem_limit = int(min(cap, 128 * 1024 * 1024) * 0.75)
    budget = int(vmem_limit * 0.85)

    G = _choose_group_size(BK, L, d_model, n_head, d_k, d_v, return_attn,
                           in_itemsize, in_itemsize, attn_itemsize, budget)
    grid = (BK // G,)

    # Host-side flatten + cast: lane/sublane-dense 2-D DMA, bf16 MXU operands.
    q2 = q.reshape(BK * L, d_model).astype(compute_dtype)
    k2 = k.reshape(BK * L, d_model).astype(compute_dtype)
    v2 = v.reshape(BK * L, d_model).astype(compute_dtype)
    m2 = mask.reshape(BK, L, L).astype(jnp.int8)          # 4x less DMA vs int32
    wq_scaled = (wq / jnp.asarray(temperature, wq.dtype)).astype(compute_dtype)
    wk_c = wk.astype(compute_dtype)
    wv_c = wv.astype(compute_dtype)

    kernel = functools.partial(
        _attention_kernel, G=G, L=L, n_head=n_head, d_k=d_k, d_v=d_v,
        return_attn=return_attn)

    in_specs = [
        pl.BlockSpec((G * L, d_model), lambda g: (g, 0)),            # q
        pl.BlockSpec((G * L, d_model), lambda g: (g, 0)),            # k
        pl.BlockSpec((G * L, d_model), lambda g: (g, 0)),            # v
        pl.BlockSpec((G, L, L), lambda g: (g, 0, 0)),                # mask int8
        pl.BlockSpec((d_model, n_head * d_k), lambda g: (0, 0)),     # wq scaled
        pl.BlockSpec((d_model, n_head * d_k), lambda g: (0, 0)),     # wk
        pl.BlockSpec((d_model, n_head * d_v), lambda g: (0, 0)),     # wv
    ]

    out_spec = pl.BlockSpec((G, L, n_head * d_v), lambda g: (g, 0, 0))
    if return_attn:
        out_shape = (
            jax.ShapeDtypeStruct((BK, L, n_head * d_v), jnp.float32),
            jax.ShapeDtypeStruct((BK, n_head, L, L), attn_dtype),
        )
        out_specs = [
            out_spec,
            pl.BlockSpec((G, n_head, L, L), lambda g: (g, 0, 0, 0)),
        ]
    else:
        out_shape = jax.ShapeDtypeStruct((BK, L, n_head * d_v), jnp.float32)
        out_specs = out_spec

    # Advisory cost estimate for XLA's scheduler.
    flops = (2 * BK * L * d_model * n_head * (2 * d_k + d_v)
             + 2 * BK * n_head * L * L * (d_k + d_v))
    transcendentals = BK * n_head * L * L + BK * n_head * L
    bytes_accessed = (3 * BK * L * d_model * in_itemsize
                      + BK * L * L
                      + (2 * d_model * n_head * d_k
                         + d_model * n_head * d_v) * in_itemsize
                      + BK * L * n_head * d_v * 4
                      + (BK * n_head * L * L * attn_itemsize
                         if return_attn else 0))

    result = pl.pallas_call(
        kernel,
        out_shape=out_shape,
        grid_spec=pltpu.PrefetchScalarGridSpec(
            num_scalar_prefetch=0,
            grid=grid,
            in_specs=in_specs,
            out_specs=out_specs,
            scratch_shapes=[pltpu.VMEM((G, L, n_head * d_v), jnp.float32)],
        ),
        compiler_params=pltpu.CompilerParams(
            dimension_semantics=("parallel",),
            vmem_limit_bytes=vmem_limit,
        ),
        cost_estimate=pl.CostEstimate(
            flops=flops,
            transcendentals=transcendentals,
            bytes_accessed=bytes_accessed,
        ),
    )(q2, k2, v2, m2, wq_scaled, wk_c, wv_c)

    if return_attn:
        out_flat, attn_flat = result
        out = out_flat.reshape(B, K, L, n_head * d_v)
        attn = attn_flat.reshape(B, K, n_head, L, L)
        return out, attn
    return result.reshape(B, K, L, n_head * d_v)


def _reference(q, k, v, mask, wq, wk, wv, *, n_head, d_k, d_v, temperature):
    """Plain-JAX reference mirroring the PyTorch forward (eval mode)."""
    B, K, L, _ = q.shape
    qp = (q @ wq).reshape(B, K, L, n_head, d_k).transpose(0, 1, 3, 2, 4)  # b k n l d
    kp = (k @ wk).reshape(B, K, L, n_head, d_k).transpose(0, 1, 3, 4, 2)  # b k n d l
    vp = (v @ wv).reshape(B, K, L, n_head, d_v).transpose(0, 1, 3, 2, 4)  # b k n l d
    attn = jnp.einsum('bknld,bkndt->bknlt', qp, kp) / temperature
    attn = jnp.where(mask[:, :, None, :, :], -1e9, attn)
    attn = jax.nn.softmax(attn, axis=-1)
    out = jnp.einsum('bknlt,bkntd->bknld', attn, vp)
    out = out.transpose(0, 1, 3, 2, 4).reshape(B, K, L, n_head * d_v)
    return out, attn


if __name__ == "__main__":
    # Small, module-consistent shapes.
    B, K, L = 2, 3, 8
    d_model = 32
    n_head = 2
    d_k = d_v = 16
    temperature = d_k ** 0.5

    key = jax.random.PRNGKey(0)
    kq, kk, kv, kwq, kwk, kwv, km = jax.random.split(key, 7)

    q = jax.random.normal(kq, (B, K, L, d_model), dtype=jnp.float32)
    k = jax.random.normal(kk, (B, K, L, d_model), dtype=jnp.float32)
    v = jax.random.normal(kv, (B, K, L, d_model), dtype=jnp.float32)

    # Deterministic synthetic weights (shapes from nn.Linear(d_model, n_head*d_k)).
    wq = 0.02 * jax.random.normal(kwq, (d_model, n_head * d_k), dtype=jnp.float32)
    wk = 0.02 * jax.random.normal(kwk, (d_model, n_head * d_k), dtype=jnp.float32)
    wv = 0.02 * jax.random.normal(kwv, (d_model, n_head * d_v), dtype=jnp.float32)

    # Boolean mask (True = masked); ~20% masked positions.
    mask = jax.random.uniform(km, (B, K, L, L)) < 0.2

    out_ref, attn_ref = _reference(
        q, k, v, mask, wq, wk, wv,
        n_head=n_head, d_k=d_k, d_v=d_v, temperature=temperature,
    )

    # 1) f32 compute path: near bit-exact vs the reference.
    out32, attn32 = scaled_dot_product_attention_bias(
        q, k, v, mask, wq, wk, wv,
        n_head=n_head, d_k=d_k, d_v=d_v, temperature=temperature,
        compute_dtype=jnp.float32,
    )
    jax.block_until_ready((out32, attn32))
    assert jnp.allclose(out32, out_ref, atol=1e-4, rtol=1e-4), \
        float(jnp.max(jnp.abs(out32 - out_ref)))
    assert jnp.allclose(attn32, attn_ref, atol=1e-4, rtol=1e-4), \
        float(jnp.max(jnp.abs(attn32 - attn_ref)))

    # 2) Default bf16 MXU-operand path (softmax stays f32): looser tolerance.
    out_bf, attn_bf = scaled_dot_product_attention_bias(
        q, k, v, mask, wq, wk, wv,
        n_head=n_head, d_k=d_k, d_v=d_v, temperature=temperature,
    )
    jax.block_until_ready((out_bf, attn_bf))
    assert jnp.allclose(out_bf, out_ref, atol=3e-2, rtol=3e-2), \
        float(jnp.max(jnp.abs(out_bf - out_ref)))
    assert jnp.allclose(attn_bf, attn_ref, atol=2e-2, rtol=2e-2), \
        float(jnp.max(jnp.abs(attn_bf - attn_ref)))

    # 3) attn-free fast path (unnormalized-P trick, no attn writeback).
    out_only = scaled_dot_product_attention_bias(
        q, k, v, mask, wq, wk, wv,
        n_head=n_head, d_k=d_k, d_v=d_v, temperature=temperature,
        return_attn=False,
    )
    jax.block_until_ready(out_only)
    assert jnp.allclose(out_only, out_ref, atol=3e-2, rtol=3e-2), \
        float(jnp.max(jnp.abs(out_only - out_ref)))

    print("KERNEL_OK")
</pallas_src>

<mosaic_0001>
module attributes {stable_mosaic.version = 11 : i64} {
  func.func @_attention_kernel(%arg0: i32, %arg1: memref<8x32xf32, #tpu.memory_space<vmem>>, %arg2: memref<8x32xf32, #tpu.memory_space<vmem>>, %arg3: memref<8x32xf32, #tpu.memory_space<vmem>>, %arg4: memref<1x8x8xi8, #tpu.memory_space<vmem>>, %arg5: memref<32x32xf32, #tpu.memory_space<vmem>>, %arg6: memref<32x32xf32, #tpu.memory_space<vmem>>, %arg7: memref<32x32xf32, #tpu.memory_space<vmem>>, %arg8: memref<1x8x32xf32, #tpu.memory_space<vmem>>, %arg9: memref<1x2x8x8xf32, #tpu.memory_space<vmem>>, %arg10: memref<1x8x32xf32, #tpu.memory_space<vmem>>) attributes {dimension_semantics = [#tpu.dimension_semantics<parallel>], iteration_bounds = array<i64: 6>, scalar_prefetch = 0 : i64, scratch_operands = 1 : i64, tpu.core_type = #tpu.core_type<tc>, window_params = [{transform_indices = @transform_0, window_bounds = array<i64: 8, 32>}, {transform_indices = @transform_1, window_bounds = array<i64: 8, 32>}, {transform_indices = @transform_2, window_bounds = array<i64: 8, 32>}, {transform_indices = @transform_3, window_bounds = array<i64: 1, 8, 8>}, {pipeline_mode = #tpu.pipeline_mode<synchronous>, transform_indices = @transform_4, window_bounds = array<i64: 32, 32>}, {pipeline_mode = #tpu.pipeline_mode<synchronous>, transform_indices = @transform_5, window_bounds = array<i64: 32, 32>}, {pipeline_mode = #tpu.pipeline_mode<synchronous>, transform_indices = @transform_6, window_bounds = array<i64: 32, 32>}, {transform_indices = @transform_7, window_bounds = array<i64: 1, 8, 32>}, {transform_indices = @transform_8, window_bounds = array<i64: 1, 2, 8, 8>}]} {
    %c0 = arith.constant 0 : index
    %c0_0 = arith.constant 0 : index
    %0 = vector.load %arg1[%c0, %c0_0] : memref<8x32xf32, #tpu.memory_space<vmem>>, vector<8x32xf32>
    %c0_1 = arith.constant 0 : index
    %c0_2 = arith.constant 0 : index
    %1 = vector.load %arg5[%c0_1, %c0_2] : memref<32x32xf32, #tpu.memory_space<vmem>>, vector<32x32xf32>
    %cst = arith.constant dense<0.000000e+00> : vector<8x32xf32>
    %2 = tpu.matmul %0, %1, %cst {dimension_numbers = #tpu.dot_dimension_numbers<[1], [0], [0], [1], [0, 0, 1, 1], [], []>} : vector<8x32xf32>, vector<32x32xf32>, vector<8x32xf32> -> vector<8x32xf32>
    %c0_3 = arith.constant 0 : index
    %c0_4 = arith.constant 0 : index
    %3 = vector.load %arg2[%c0_3, %c0_4] : memref<8x32xf32, #tpu.memory_space<vmem>>, vector<8x32xf32>
    %c0_5 = arith.constant 0 : index
    %c0_6 = arith.constant 0 : index
    %4 = vector.load %arg6[%c0_5, %c0_6] : memref<32x32xf32, #tpu.memory_space<vmem>>, vector<32x32xf32>
    %cst_7 = arith.constant dense<0.000000e+00> : vector<8x32xf32>
    %5 = tpu.matmul %3, %4, %cst_7 {dimension_numbers = #tpu.dot_dimension_numbers<[1], [0], [0], [1], [0, 0, 1, 1], [], []>} : vector<8x32xf32>, vector<32x32xf32>, vector<8x32xf32> -> vector<8x32xf32>
    %c0_8 = arith.constant 0 : index
    %c0_9 = arith.constant 0 : index
    %6 = vector.load %arg3[%c0_8, %c0_9] : memref<8x32xf32, #tpu.memory_space<vmem>>, vector<8x32xf32>
    %c0_10 = arith.constant 0 : index
    %c0_11 = arith.constant 0 : index
    %7 = vector.load %arg7[%c0_10, %c0_11] : memref<32x32xf32, #tpu.memory_space<vmem>>, vector<32x32xf32>
    %cst_12 = arith.constant dense<0.000000e+00> : vector<8x32xf32>
    %8 = tpu.matmul %6, %7, %cst_12 {dimension_numbers = #tpu.dot_dimension_numbers<[1], [0], [0], [1], [0, 0, 1, 1], [], []>} : vector<8x32xf32>, vector<32x32xf32>, vector<8x32xf32> -> vector<8x32xf32>
    %c0_13 = arith.constant 0 : index
    %c0_14 = arith.constant 0 : index
    %c0_15 = arith.constant 0 : index
    %9 = vector.load %arg4[%c0_13, %c0_14, %c0_15] : memref<1x8x8xi8, #tpu.memory_space<vmem>>, vector<1x8x8xi8>
    %c0_i8 = arith.constant 0 : i8
    %10 = vector.broadcast %c0_i8 : i8 to vector<1x8x8xi8>
    %11 = arith.cmpi ne, %9, %10 : vector<1x8x8xi8>
    %12 = vector.extract_strided_slice %2 {offsets = [0, 0], sizes = [8, 16], strides = [1, 1]} : vector<8x32xf32> to vector<8x16xf32>
    %13 = vector.shape_cast %12 : vector<8x16xf32> to vector<1x8x16xf32>
    %14 = vector.extract_strided_slice %5 {offsets = [0, 0], sizes = [8, 16], strides = [1, 1]} : vector<8x32xf32> to vector<8x16xf32>
    %15 = vector.shape_cast %14 : vector<8x16xf32> to vector<1x8x16xf32>
    %16 = vector.extract_strided_slice %8 {offsets = [0, 0], sizes = [8, 16], strides = [1, 1]} : vector<8x32xf32> to vector<8x16xf32>
    %17 = vector.shape_cast %16 : vector<8x16xf32> to vector<1x8x16xf32>
    "tpu.trace_start"() <{level = 10 : i32, message = "gld,gtd->glt"}> : () -> ()
    %cst_16 = arith.constant dense<0.000000e+00> : vector<1x8x8xf32>
    %18 = tpu.matmul %13, %15, %cst_16 {dimension_numbers = #tpu.dot_dimension_numbers<[2], [2], [1], [1], [0, 0, 0, 1, 1, 1], [0], [0]>} : vector<1x8x16xf32>, vector<1x8x16xf32>, vector<1x8x8xf32> -> vector<1x8x8xf32>
    %cst_17 = arith.constant -1.000000e+09 : f32
    "tpu.trace_stop"() : () -> ()
    %19 = vector.broadcast %cst_17 : f32 to vector<1x8x8xf32>
    %20 = arith.select %11, %19, %18 : vector<1x8x8xi1>, vector<1x8x8xf32>
    %cst_18 = arith.constant dense<0xFF800000> : vector<1x8xf32>
    %21 = vector.multi_reduction <maximumf>, %20, %cst_18 [2] : vector<1x8x8xf32> to vector<1x8xf32>
    %22 = vector.shape_cast %21 : vector<1x8xf32> to vector<1x8x1xf32>
    %23 = vector.broadcast %22 : vector<1x8x1xf32> to vector<1x8x8xf32>
    %24 = arith.subf %20, %23 : vector<1x8x8xf32>
    %25 = math.exp %24 : vector<1x8x8xf32>
    %cst_19 = arith.constant dense<0.000000e+00> : vector<1x8xf32>
    %26 = vector.multi_reduction <add>, %25, %cst_19 [2] : vector<1x8x8xf32> to vector<1x8xf32>
    %27 = vector.shape_cast %26 : vector<1x8xf32> to vector<1x8x1xf32>
    %28 = tpu.reciprocal %27 {approx = true} : vector<1x8x1xf32> -> vector<1x8x1xf32>
    %29 = arith.mulf %27, %28 : vector<1x8x1xf32>
    %cst_20 = arith.constant 2.000000e+00 : f32
    %30 = vector.broadcast %cst_20 : f32 to vector<1x8x1xf32>
    %31 = arith.subf %30, %29 : vector<1x8x1xf32>
    %32 = arith.mulf %28, %31 : vector<1x8x1xf32>
    %33 = vector.broadcast %32 : vector<1x8x1xf32> to vector<1x8x8xf32>
    %34 = arith.mulf %25, %33 : vector<1x8x8xf32>
    %35 = vector.shape_cast %34 : vector<1x8x8xf32> to vector<1x1x8x8xf32>
    %c0_21 = arith.constant 0 : index
    %c0_22 = arith.constant 0 : index
    %c0_23 = arith.constant 0 : index
    %c0_24 = arith.constant 0 : index
    %36 = vector.load %arg9[%c0_21, %c0_22, %c0_23, %c0_24] : memref<1x2x8x8xf32, #tpu.memory_space<vmem>>, vector<1x1x8x8xf32>
    tpu.vector_store %arg9[%c0_21, %c0_22, %c0_23, %c0_24], %35 {strides = array<i32>} : memref<1x2x8x8xf32, #tpu.memory_space<vmem>>, vector<1x1x8x8xf32>,
    "tpu.trace_start"() <{level = 10 : i32, message = "glt,gtd->gld"}> : () -> ()
    %cst_25 = arith.constant dense<0.000000e+00> : vector<1x8x16xf32>
    %37 = tpu.matmul %34, %17, %cst_25 {dimension_numbers = #tpu.dot_dimension_numbers<[2], [1], [1], [2], [0, 0, 0, 1, 1, 2], [0], [0]>} : vector<1x8x8xf32>, vector<1x8x16xf32>, vector<1x8x16xf32> -> vector<1x8x16xf32>
    "tpu.trace_stop"() : () -> ()
    %c0_26 = arith.constant 0 : index
    %c0_27 = arith.constant 0 : index
    %c0_28 = arith.constant 0 : index
    %38 = vector.load %arg10[%c0_26, %c0_27, %c0_28] : memref<1x8x32xf32, #tpu.memory_space<vmem>>, vector<1x8x16xf32>
    tpu.vector_store %arg10[%c0_26, %c0_27, %c0_28], %37 {strides = array<i32>} : memref<1x8x32xf32, #tpu.memory_space<vmem>>, vector<1x8x16xf32>,
    %39 = vector.extract_strided_slice %2 {offsets = [0, 16], sizes = [8, 16], strides = [1, 1]} : vector<8x32xf32> to vector<8x16xf32>
    %40 = vector.shape_cast %39 : vector<8x16xf32> to vector<1x8x16xf32>
    %41 = vector.extract_strided_slice %5 {offsets = [0, 16], sizes = [8, 16], strides = [1, 1]} : vector<8x32xf32> to vector<8x16xf32>
    %42 = vector.shape_cast %41 : vector<8x16xf32> to vector<1x8x16xf32>
    %43 = vector.extract_strided_slice %8 {offsets = [0, 16], sizes = [8, 16], strides = [1, 1]} : vector<8x32xf32> to vector<8x16xf32>
    %44 = vector.shape_cast %43 : vector<8x16xf32> to vector<1x8x16xf32>
    "tpu.trace_start"() <{level = 10 : i32, message = "gld,gtd->glt"}> : () -> ()
    %cst_29 = arith.constant dense<0.000000e+00> : vector<1x8x8xf32>
    %45 = tpu.matmul %40, %42, %cst_29 {dimension_numbers = #tpu.dot_dimension_numbers<[2], [2], [1], [1], [0, 0, 0, 1, 1, 1], [0], [0]>} : vector<1x8x16xf32>, vector<1x8x16xf32>, vector<1x8x8xf32> -> vector<1x8x8xf32>
    %cst_30 = arith.constant -1.000000e+09 : f32
    "tpu.trace_stop"() : () -> ()
    %46 = vector.broadcast %cst_30 : f32 to vector<1x8x8xf32>
    %47 = arith.select %11, %46, %45 : vector<1x8x8xi1>, vector<1x8x8xf32>
    %cst_31 = arith.constant dense<0xFF800000> : vector<1x8xf32>
    %48 = vector.multi_reduction <maximumf>, %47, %cst_31 [2] : vector<1x8x8xf32> to vector<1x8xf32>
    %49 = vector.shape_cast %48 : vector<1x8xf32> to vector<1x8x1xf32>
    %50 = vector.broadcast %49 : vector<1x8x1xf32> to vector<1x8x8xf32>
    %51 = arith.subf %47, %50 : vector<1x8x8xf32>
    %52 = math.exp %51 : vector<1x8x8xf32>
    %cst_32 = arith.constant dense<0.000000e+00> : vector<1x8xf32>
    %53 = vector.multi_reduction <add>, %52, %cst_32 [2] : vector<1x8x8xf32> to vector<1x8xf32>
    %54 = vector.shape_cast %53 : vector<1x8xf32> to vector<1x8x1xf32>
    %55 = tpu.reciprocal %54 {approx = true} : vector<1x8x1xf32> -> vector<1x8x1xf32>
    %56 = arith.mulf %54, %55 : vector<1x8x1xf32>
    %cst_33 = arith.constant 2.000000e+00 : f32
    %57 = vector.broadcast %cst_33 : f32 to vector<1x8x1xf32>
    %58 = arith.subf %57, %56 : vector<1x8x1xf32>
    %59 = arith.mulf %55, %58 : vector<1x8x1xf32>
    %60 = vector.broadcast %59 : vector<1x8x1xf32> to vector<1x8x8xf32>
    %61 = arith.mulf %52, %60 : vector<1x8x8xf32>
    %62 = vector.shape_cast %61 : vector<1x8x8xf32> to vector<1x1x8x8xf32>
    %c0_34 = arith.constant 0 : index
    %c1 = arith.constant 1 : index
    %c0_35 = arith.constant 0 : index
    %c0_36 = arith.constant 0 : index
    %63 = vector.load %arg9[%c0_34, %c1, %c0_35, %c0_36] : memref<1x2x8x8xf32, #tpu.memory_space<vmem>>, vector<1x1x8x8xf32>
    tpu.vector_store %arg9[%c0_34, %c1, %c0_35, %c0_36], %62 {strides = array<i32>} : memref<1x2x8x8xf32, #tpu.memory_space<vmem>>, vector<1x1x8x8xf32>,
    "tpu.trace_start"() <{level = 10 : i32, message = "glt,gtd->gld"}> : () -> ()
    %cst_37 = arith.constant dense<0.000000e+00> : vector<1x8x16xf32>
    %64 = tpu.matmul %61, %44, %cst_37 {dimension_numbers = #tpu.dot_dimension_numbers<[2], [1], [1], [2], [0, 0, 0, 1, 1, 2], [0], [0]>} : vector<1x8x8xf32>, vector<1x8x16xf32>, vector<1x8x16xf32> -> vector<1x8x16xf32>
    "tpu.trace_stop"() : () -> ()
    %c0_38 = arith.constant 0 : index
    %c0_39 = arith.constant 0 : index
    %c16 = arith.constant 16 : index
    %65 = vector.load %arg10[%c0_38, %c0_39, %c16] : memref<1x8x32xf32, #tpu.memory_space<vmem>>, vector<1x8x16xf32>
    tpu.vector_store %arg10[%c0_38, %c0_39, %c16], %64 {strides = array<i32>} : memref<1x8x32xf32, #tpu.memory_space<vmem>>, vector<1x8x16xf32>,
    %c0_40 = arith.constant 0 : index
    %c0_41 = arith.constant 0 : index
    %c0_42 = arith.constant 0 : index
    %66 = vector.load %arg10[%c0_40, %c0_41, %c0_42] : memref<1x8x32xf32, #tpu.memory_space<vmem>>, vector<1x8x32xf32>
    %c0_43 = arith.constant 0 : index
    %c0_44 = arith.constant 0 : index
    %c0_45 = arith.constant 0 : index
    %67 = vector.load %arg8[%c0_43, %c0_44, %c0_45] : memref<1x8x32xf32, #tpu.memory_space<vmem>>, vector<1x8x32xf32>
    tpu.vector_store %arg8[%c0_43, %c0_44, %c0_45], %66 {strides = array<i32>} : memref<1x8x32xf32, #tpu.memory_space<vmem>>, vector<1x8x32xf32>,
    return
  }
  func.func @transform_0(%arg0: i32) -> (i32, i32) {
    %c0_i32 = arith.constant 0 : i32
    %c0_i32_0 = arith.constant 0 : i32
    return %arg0, %c0_i32 : i32, i32
  }
  func.func @transform_1(%arg0: i32) -> (i32, i32) {
    %c0_i32 = arith.constant 0 : i32
    %c0_i32_0 = arith.constant 0 : i32
    return %arg0, %c0_i32 : i32, i32
  }
  func.func @transform_2(%arg0: i32) -> (i32, i32) {
    %c0_i32 = arith.constant 0 : i32
    %c0_i32_0 = arith.constant 0 : i32
    return %arg0, %c0_i32 : i32, i32
  }
  func.func @transform_3(%arg0: i32) -> (i32, i32, i32) {
    %c0_i32 = arith.constant 0 : i32
    %c0_i32_0 = arith.constant 0 : i32
    %c0_i32_1 = arith.constant 0 : i32
    return %arg0, %c0_i32, %c0_i32_0 : i32, i32, i32
  }
  func.func @transform_4(%arg0: i32) -> (i32, i32) {
    %c0_i32 = arith.constant 0 : i32
    %c0_i32_0 = arith.constant 0 : i32
    %c0_i32_1 = arith.constant 0 : i32
    return %c0_i32, %c0_i32_0 : i32, i32
  }
  func.func @transform_5(%arg0: i32) -> (i32, i32) {
    %c0_i32 = arith.constant 0 : i32
    %c0_i32_0 = arith.constant 0 : i32
    %c0_i32_1 = arith.constant 0 : i32
    return %c0_i32, %c0_i32_0 : i32, i32
  }
  func.func @transform_6(%arg0: i32) -> (i32, i32) {
    %c0_i32 = arith.constant 0 : i32
    %c0_i32_0 = arith.constant 0 : i32
    %c0_i32_1 = arith.constant 0 : i32
    return %c0_i32, %c0_i32_0 : i32, i32
  }
  func.func @transform_7(%arg0: i32) -> (i32, i32, i32) {
    %c0_i32 = arith.constant 0 : i32
    %c0_i32_0 = arith.constant 0 : i32
    %c0_i32_1 = arith.constant 0 : i32
    return %arg0, %c0_i32, %c0_i32_0 : i32, i32, i32
  }
  func.func @transform_8(%arg0: i32) -> (i32, i32, i32, i32) {
    %c0_i32 = arith.constant 0 : i32
    %c0_i32_0 = arith.constant 0 : i32
    %c0_i32_1 = arith.constant 0 : i32
    %c0_i32_2 = arith.constant 0 : i32
    return %arg0, %c0_i32, %c0_i32_0, %c0_i32_1 : i32, i32, i32, i32
  }
}

</mosaic_0001>

<bundles_post_ra>
// kernel: tpu_custom_call.1
= control target key start
LH: loop header
LB: loop body
LE: loop exit
PB: predicated region body
PF: predicated region fallthrough
CT: control target
= control target key end

     0   :  { %14 = vsyncpa [#allocation4], 0  ;;  %s1672_s0 = inlined_call_operand.vmem [shape: f32[48,32], index: 0, kind: input, shape index: {}]   ;;  %s1673_s1 = inlined_call_operand.vmem [shape: f32[48,32], index: 1, kind: input, shape index: {}]   ;;  %s1674_s2 = inlined_call_operand.vmem [shape: f32[48,32], index: 2, kind: input, shape index: {}]   ;;  %s1675_s3 = inlined_call_operand.vmem [shape: s8[6,8,8], index: 3, kind: input, shape index: {}]   ;;  %s1676_s4 = inlined_call_operand.vmem [shape: f32[32,32], index: 4, kind: input, shape index: {}]   ;;  %s1677_s5 = inlined_call_operand.vmem [shape: f32[32,32], index: 5, kind: input, shape index: {}]   ;;  %s1678_s6 = inlined_call_operand.vmem [shape: f32[32,32], index: 6, kind: input, shape index: {}]   ;;  %s1679_s7 = inlined_call_operand.hbm [shape: f32[6,8,32], index: 7, kind: output, shape index: {0}]   ;;  %s1680_s8 = inlined_call_operand.hbm [shape: f32[6,2,8,8], index: 8, kind: output, shape index: {1}]  }
   0x1   :  { %16 = vsyncpa [#allocation4 + $0x1], 0 }
   0x2   :  { %17 = vsyncpa [#allocation6], 0 }
   0x3   :  { %19 = vsyncpa [#allocation6 + $0x1], 0  ;;  %s1448_s27 = smov 0   ;;  %s1450_s28 = smov 0  }
   0x4   :  { %s1452_s29 = smov 0   ;;  %s1454_s30 = smov 0  }
   0x5 LB: > { %s1469_s9 = sadd.s32 4294967295, %s1391_s30   ;;  %s1115_s10 = sadd.s32 4294967294, %s1391_s30   ;;  %s1391_s30 = sphi %s1454_s30, %s1686_s30   ;;  %s1387_s29 = sphi %s1452_s29, %s1685_s29   ;;  %s1383_s28 = sphi %s1450_s28, %s1684_s28   ;;  %s1379_s27 = sphi %s1448_s27, %s1683_s27  }
   0x6   : > { %s1473_s11 = sadd.s32 1, %s1391_s30   ;;  %s199_s12 = sadd.s32 1, %s1387_s29 }
   0x7   : > { %s196_s13 = ssub.s32 %s1391_s30, %s1473_s11  ;;  %p209_p0 = scmp.ne.s32.totalorder %s1387_s29, %s1383_s28 }
   0x8   : > { %p197_p1 = scmp.eq.s32.totalorder %s196_s13, 0  ;;  %p210_p2 = scmp.eq.s32.totalorder %s1469_s9, 5 }
   0x9   : > { %p215_p3 = scmp.ne.s32.totalorder %s1383_s28, %s1379_s27  ;;  %p216_p4 = scmp.eq.s32.totalorder %s1115_s10, 5 }
   0xa   : > { %s1484_s14 = scalar_select %p197_p1, %s1387_s29, %s199_s12  }
   0xb   : > { %p1486_p5 = por %p210_p2, %p209_p0  ;;  %p1490_p6 = por %p216_p4, %p215_p3 }
   0xc   : > { %p1118_p7 = scmp.ge.s32.totalorder %s1391_s30, 1  ;;  %p297_p8 = scmp.lt.s32.totalorder %s1391_s30, 7 }
   0xe   : > { %p298_p9 = pnand %p1118_p7, %p297_p8 }
   0xf   : > { %v445_v0 = vld [vmem:[%s1677_s5] sm:$0xff] (!%p298_p9)  ;;  %v446_v1 = vld [vmem:[%s1677_s5 + $0x8] sm:$0xff] (!%p298_p9)  ;;  %v1393_v3 = vmov (!%p298_p9), 0.0|0.0   ;;  %v447_v6 = vld [vmem:[%s1677_s5 + $0x10] sm:$0xff] (!%p298_p9)  ;;  %p347_p10 = scmp.lt.s32.totalorder (!%p298_p9), %s1469_s9, 5  ;;  %vm1394_vm0 = vmmov (!%p298_p9), 0  }
  0x10   : > { %301 = sbr.rel (%p298_p9) target bundleno = 1241 (0x4d9), region = 48  ;;  %v366_v2 = vld [vmem:[%s1676_s4] sm:$0xff] (!%p298_p9)  ;;  %1225 = vmatprep.subr.bf16.mxu1 (!%p298_p9), %v1393_v3  ;;  %v1226_v4 = vpack.c.bf16 (!%p298_p9), %v446_v1, %v445_v0  ;;  %1219 = vmatprep.subr.bf16.mxu0 (!%p298_p9), %v1393_v3  ;;  %v367_v5 = vld [vmem:[%s1676_s4 + $0x8] sm:$0xff] (!%p298_p9)  ;;  %v448_v7 = vld [vmem:[%s1677_s5 + $0x18] sm:$0xff] (!%p298_p9)  ;;  %v1395_v9 = vmov (!%p298_p9), 0.0   ;;  %vm370_vm1 = vcmask (!%p298_p9), 261120  }
  0x11   : > { %v1220_v8 = vpack.c.bf16 (!%p298_p9), %v367_v5, %v366_v2  ;;  %1185 = vmatprep.mubr.msk.f32.mxu1 (!%p298_p9), %vm1394_vm0, %v1395_v9  ;;  %v368_v10 = vld [vmem:[%s1676_s4 + $0x10] sm:$0xff] (!%p298_p9)  ;;  %v369_v11 = vld [vmem:[%s1676_s4 + $0x18] sm:$0xff] (!%p298_p9)  ;;  %1174 = vmatprep.mubr.msk.f32.mxu0 (!%p298_p9), %vm1394_vm0, %v1395_v9  ;;  %v1229_v12 = vpack.c.bf16 (!%p298_p9), %v448_v7, %v447_v6  ;;  %v523_v16 = vld [vmem:[%s1678_s6] sm:$0xff] (!%p298_p9)  ;;  %vm602_vm2 = vcmask (!%p298_p9), 130048   ;;  %s1396_s12 = smov (!%p298_p9), 112   ;;  %v1397_v32 = vmov (!%p298_p9), 0  }
  0x12   : > { %1227 = vmatpush3.bf16.msra.mxu1 (!%p298_p9), %v1226_v4  ;;  %v1223_v13 = vpack.c.bf16 (!%p298_p9), %v369_v11, %v368_v10  ;;  %v524_v17 = vld [vmem:[%s1678_s6 + $0x8] sm:$0xff] (!%p298_p9)  ;;  %v525_v18 = vld [vmem:[%s1678_s6 + $0x10] sm:$0xff] (!%p298_p9)  ;;  %v526_v20 = vld [vmem:[%s1678_s6 + $0x18] sm:$0xff] (!%p298_p9)  ;;  %vm683_vm5 = vcmask (!%p298_p9), 64512   ;;  %s1142_s23 = sshll.u32 (!%p298_p9), %s1469_s9, 8  ;;  %s1399_s17 = smov (!%p298_p9), [#allocation5]  }
  0x13   : > { %1221 = vmatpush3.bf16.msra.mxu0 (!%p298_p9), %v1220_v8  ;;  %1228 = vmatprep.subr.bf16.mxu1 (!%p298_p9), %v1393_v3  ;;  %v1232_v19 = vpack.c.bf16 (!%p298_p9), %v524_v17, %v523_v16  ;;  %v1235_v21 = vpack.c.bf16 (!%p298_p9), %v526_v20, %v525_v18 }
  0x14   : > { %1222 = vmatprep.subr.bf16.mxu0 (!%p298_p9), %v1393_v3 }
  0x16   : > { %1230 = vmatpush3.bf16.msra.mxu1 (!%p298_p9), %v1229_v12 }
  0x17   : > { %s1526_s20 = scalar_select %p347_p10, %s1469_s9, 5  ;;  %1224 = vmatpush3.bf16.msra.mxu0 %v1223_v13  ;;  %1199 = vmatprep.subr.mxu1 %v1395_v9 }
  0x18   : > { %1231 = vmatprep.subr.bf16.mxu0 %v1393_v3 }
  0x19   : > { %s1121_s21 = sshll.u32 %s1526_s20, 3 }
  0x1a   : > { %s354_s24 = scalar_lea.vmem %s1673_s1, %s1121_s21  ;;  %s350_s10 = scalar_lea.vmem %s1672_s0, %s1121_s21 }
  0x1b   : > { %v444_v14 = vld [vmem:[%s354_s24] sm:$0xff] }
  0x1c   : > { %v365_v15 = vld [vmem:[%s350_s10] sm:$0xff]  ;;  %1186 = vmatmul.mubr.msk.f32.vlgmr.msra.gmra.mrb[0].mxu1 %vm370_vm1, %v444_v14  ;;  %s358_s10 = scalar_lea.vmem %s1674_s2, %s1121_s21  ;;  %s1124_s21 = sshll.u32 %s1526_s20, 1 }
  0x1d   : > { %1175 = vmatmul.mubr.msk.f32.vlgmr.msra.gmra.mrb[0].mxu0 %vm370_vm1, %v365_v15  ;;  %1201 = vmatprep.mubr.msk.f32.mxu1 %vm1394_vm0, %v1395_v9  ;;  %v522_v22 = vld [vmem:[%s358_s10] sm:$0xff]  ;;  %s362_s18 = scalar_lea.vmem %s1675_s3, %s1124_s21  ;;  %s1581_s20 = sand.u32 1, %s1383_s28  }
  0x1e   : > { %1196 = vmatprep.mubr.msk.f32.mxu0 %vm1394_vm0, %v1395_v9  ;;  %1233 = vmatpush3.bf16.msra.mxu0 %v1232_v19  ;;  %v600_v31 = vld [vmem:[%s362_s18] sm:$0x3]  ;;  %s1120_s19 = sshll.u32 %s1581_s20, 4  ;;  %s1595_s10 = scalar_lea.hbm %s1680_s8, %s1142_s23 }
  0x1f   : > { %1234 = vmatprep.subr.bf16.mxu0 %v1393_v3  ;;  %vm601_vm3 = vnez %v600_v31  ;;  %s346_s22 = scalar_lea.vmem [#allocation5], %s1120_s19  ;;  %s959_s21 = scalar_lea.sflag [#allocation6], %s1581_s20 }
  0x20   : > { %v679_v33 = vsel %vm601_vm3, 16843009, %v1397_v32  ;;  %s985_s24 = sshll.u32 %s346_s22, 4  ;;  %s1301_s18 = sshll.u32 %s1399_s17, 4  ;;  %s1597_s24 = int_to_ptr.vmem [resolvable:$true] %s985_s24  ;;  %s1302_s18 = int_to_ptr.vmem [resolvable:$false] %s1301_s18 }
  0x21   : > { %v680_v34 = vunpack.c.0.s8 %v679_v33  ;;  %s1297_s13 = scalar_lea.vmem %s1597_s24, 256  ;;  %s1303_s19 = scalar_lea.vmem %s1302_s18, 512 }
  0x22   : > { %1236 = vmatpush3.bf16.msra.mxu0 %v1235_v21  ;;  %p1298_p11 = scmp.ne.s32.totalorder %s1597_s24, %s1297_s13  ;;  %p1304_p0 = scmp.lt.s32.totalorder %s1597_s24, %s1302_s18 }
  0x23   : > { %1209 = vmatprep.subr.mxu0 %v1395_v9  ;;  %vm681_vm4 = vcmp.ne.s32.totalorder %v680_v34, 0  ;;  %p1305_p1 = scmp.lt.s32.totalorder %s1303_s19, %s1297_s13 }
  0x24   : > { %p1299_p12 = pnand %p1298_p11, %p1486_p5 }
  0x25   : > { %1197 = vmatmul.mubr.msk.f32.vlgmr.msra.gmra.mrb[2].mxu0 %vm370_vm1, %v522_v22  ;;  %p1306_p2 = por %p1305_p1, %p1304_p0 }
  0x26   : > { %1211 = vmatprep.mubr.msk.f32.mxu0 %vm1394_vm0, %v1395_v9  ;;  %p1300_p13 = pneg %p1299_p12 }
  0x28   : > { %p1307_p3 = pnand %p1306_p2, %p1300_p13 }
  0xef   : > { %v518_v23 = vpop.f32.mrb[0].mxu1 }
  0xf0   : > { %775 = vrot.lane.b32.xlu0 %v518_v23, %s1396_s12  ;;  %v1187_v24 = vpop.f32.mrb[1].mxu1  ;;  %1200 = vmatpush3.xpose.msk.msra.mxu1 %vm602_vm2, %v518_v23  ;;  %v440_v25 = vpop.f32.mrb[0].mxu0 }
  0xf1   : > { %v1176_v26 = vpop.f32.mrb[1].mxu0  ;;  %1204 = vmatprep.subr.mxu1 %v1395_v9 }
  0xf3   : > { %1202 = vmatmul.mubr.msk.f32.vlgmr.msra.gmra.mrb[2].mxu1 %vm602_vm2, %v440_v25 }
  0xf4   : > { %773 = vrot.lane.b32.xlu0 %v440_v25, %s1396_s12  ;;  %1206 = vmatprep.mubr.msk.f32.mxu1 %vm1394_vm0, %v1395_v9 }
  0xf8   : > { %v596_v29 = vpop.f32.mrb[2].mxu0 }
  0xf9   : > { %v1198_v30 = vpop.f32.mrb[3].mxu0  ;;  %1205 = vmatpush3.msra.mxu1 %v596_v29 }
  0xfa   : > { %1214 = vmatprep.subr.mxu1 %v1395_v9 }
 0x162   : > { %v776_v27 = vpop.permute.xlu0 %775 }
 0x163   : > { %1210 = vmatpush3.xpose.msk.msra.mxu0 %vm602_vm2, %v776_v27 }
 0x166   : > { %v774_v28 = vpop.permute.xlu0 %773 }
 0x167   : > { %1212 = vmatmul.mubr.msk.f32.vlgmr.msra.gmra.mrb[4].mxu0 %vm602_vm2, %v774_v28 }
 0x1c6   : > { %v675_v35 = vpop.f32.mrb[2].mxu1 }
 0x1c7   : > { %v682_v36 = vsel %vm681_vm4, -1e+09, %v675_v35  ;;  %v1203_v37 = vpop.f32.mrb[3].mxu1 }
 0x1c8   : > { %v684_v38 = vsel %vm683_vm5, %v682_v36, -inf }
 0x1c9   : > { %685 = vmax.xlane.f32.xlu1 %v684_v38 }
 0x23a   : > { %v847_v39 = vpop.f32.mrb[4].mxu0 }
 0x23b   : > { %v851_v40 = vsel %vm681_vm4, -1e+09, %v847_v39  ;;  %v1213_v41 = vpop.f32.mrb[5].mxu0 }
 0x23c   : > { %v852_v42 = vsel %vm683_vm5, %v851_v40, -inf }
 0x23d   : > { %853 = vmax.xlane.f32.xlu1 %v852_v42 }
 0x256   : > { %v686_v43 = vpop.xlane.xlu1 %685 }
 0x257   : > { %v687_v44 = vsub.f32 %v682_v36, %v686_v43 }
 0x259   : > { %v688_v45 = vmul.f32 1.442695, %v687_v44 }
 0x25b   : > { %1289 = vpow2.f32 %v688_v45 }
 0x265   : > { %v1290_v46 = vpop.eup %1289 }
 0x266   : > { %v690_v47 = vsel %vm683_vm5, %v1290_v46, 0.0 }
 0x267   : > { %691 = vadd.xlane.f32.xlu0 %v690_v47 }
 0x2ca   : > { %v854_v48 = vpop.xlane.xlu1 %853 }
 0x2cb   : > { %v855_v49 = vsub.f32 %v851_v40, %v854_v48 }
 0x2cd   : > { %v856_v50 = vmul.f32 1.442695, %v855_v49 }
 0x2cf   : > { %1291 = vpow2.f32 %v856_v50 }
 0x2d9   : > { %v1292_v51 = vpop.eup %1291 }
 0x2da   : > { %v858_v52 = vsel %vm683_vm5, %v1292_v51, 0.0 }
 0x2db   : > { %859 = vadd.xlane.f32.xlu1 %v858_v52 }
 0x2ec   : > { %869 = vrot.lane.b32.xlu1 %v596_v29, %s1396_s12  ;;  %s1398_s12 = smov 16  }
 0x2f4   : > { %v692_v53 = vpop.xlane.xlu0 %691 }
 0x2f5   : > { %1293 = vrcp.f32 %v692_v53 }
 0x2ff   : > { %v1294_v54 = vpop.eup %1293 }
 0x300   : > { %v694_v55 = vmul.f32 %v1294_v54, %v692_v53 }
 0x302   : > { %v695_v56 = vsub.f32 2.0, %v694_v55 }
 0x304   : > { %v696_v57 = vmul.f32 %v1294_v54, %v695_v56 }
 0x306   : > { %v697_v58 = vmul.f32 %v1290_v46, %v696_v57 }
 0x308   : > { %1207 = vmatmul.mubr.msk.f32.vlgmr.msra.gmra.mrb[4].mxu1 %vm683_vm5, %v697_v58  ;;  %698 = vst.msk [vmem:[%s346_s22] sm:$0xff] %vm683_vm5, %v697_v58 }
 0x309   : > { %1216 = vmatprep.mubr.msk.f32.mxu1 %vm1394_vm0, %v1395_v9 }
 0x368   : > { %v860_v59 = vpop.xlane.xlu1 %859 }
 0x369   : > { %1295 = vrcp.f32 %v860_v59 }
 0x36c   : > { %v870_v60 = vpop.permute.xlu1 %869 }
 0x36d   : > { %1215 = vmatpush3.msra.mxu1 %v870_v60 }
 0x373   : > { %v1296_v61 = vpop.eup %1295 }
 0x374   : > { %v862_v62 = vmul.f32 %v1296_v61, %v860_v59 }
 0x376   : > { %v863_v63 = vsub.f32 2.0, %v862_v62 }
 0x378   : > { %v864_v0 = vmul.f32 %v1296_v61, %v863_v63 }
 0x37a   : > { %v865_v1 = vmul.f32 %v1292_v51, %v864_v0 }
 0x37c   : > { %1217 = vmatmul.mubr.msk.f32.vlgmr.msra.gmra.mrb[6].mxu1 %vm683_vm5, %v865_v1  ;;  %1133 = vst.msk [vmem:[%s346_s22 + $0x8] sm:$0xff] %vm683_vm5, %v865_v1 }
 0x3db   : > { %v768_v2 = vpop.f32.mrb[4].mxu1 }
 0x3dc   : > { %772 = vst.msk [vmem:[#allocation2] sm:$0xff] %vm602_vm2, %v768_v2  ;;  %v1208_v3 = vpop.f32.mrb[5].mxu1 }
 0x44f   : > { %v941_v4 = vpop.f32.mrb[6].mxu1 }
 0x450   : > { %946 = vrot.lane.b32.xlu1 %v941_v4, %s1398_s12  ;;  %v1218_v5 = vpop.f32.mrb[7].mxu1 }
 0x451   : > { %1310 = shalt.err (!%p1307_p3)
}
 0x452   : > { %s1311_s22 = scalar_lea.hbm %s1595_s10, 256  ;;  %s1315_s26 = scalar_lea.hbm %s1680_s8, 1536 }
 0x453   : > { %p1312_p4 = scmp.ne.s32.totalorder %s1595_s10, %s1311_s22  ;;  %p1316_p9 = scmp.lt.u32.totalorder %s1595_s10, %s1680_s8 }
 0x454   : > { %p1317_p10 = scmp.lt.u32.totalorder %s1315_s26, %s1311_s22  ;;  %p1319_p12 = scmp.lt.u32.totalorder %s1311_s22, %s1595_s10 }
 0x455   : > { %p1313_p7 = pnand %p1312_p4, %p1486_p5 }
 0x456   : > { %p1318_p11 = por %p1317_p10, %p1316_p9 }
 0x457   : > { %p1314_p8 = pneg %p1313_p7 }
 0x458   : > { %p1320_p13 = por %p1319_p12, %p1318_p11 }
 0x45a   : > { %p1321_p0 = pnand %p1320_p13, %p1314_p8 }
 0x45c   : > { %1324 = shalt.err (!%p1321_p0)
}
 0x45d   : > { %s1400_s13 = smov 128   ;;  %s1401_s18 = smov 8   ;;  %vm949_vm6 = vcmask 261248  }
 0x45e   : > { %1238 = dma.vmem_to_hbm [thread:$0]  (%p1486_p5), %s1597_s24, 256, %s1595_s10, %s959_s21, %s1400_s13, %s1400_s13, %s1401_s18  }
 0x45f   : > { %s1119_s19 = sshll.u32 %s1581_s20, 3  ;;  %s1137_s22 = sshll.u32 %s1469_s9, 7 }
 0x460   : > { %s339_s23 = scalar_lea.vmem [#allocation3], %s1119_s19  ;;  %s1628_s17 = scalar_lea.hbm %s1679_s7, %s1137_s22 }
 0x461   : > { %s972_s25 = sshll.u32 %s339_s23, 4  ;;  %s954_s24 = scalar_lea.sflag [#allocation4], %s1581_s20  ;;  %s1630_s25 = int_to_ptr.vmem [resolvable:$true] %s972_s25 }
 0x462   : > { %s1325_s10 = scalar_lea.vmem %s1630_s25, 128  ;;  %s1402_s9 = smov [#allocation3]  }
 0x463   : > { %p1326_p1 = scmp.ne.s32.totalorder %s1630_s25, %s1325_s10  ;;  %s1329_s21 = sshll.u32 %s1402_s9, 4  ;;  %s1330_s21 = int_to_ptr.vmem [resolvable:$false] %s1329_s21 }
 0x464   : > { %s1331_s13 = scalar_lea.vmem %s1330_s21, 256  ;;  %p1332_p4 = scmp.lt.s32.totalorder %s1630_s25, %s1330_s21 }
 0x465   : > { %p1327_p2 = pnand %p1326_p1, %p1486_p5  ;;  %p1333_p7 = scmp.lt.s32.totalorder %s1331_s13, %s1325_s10 }
 0x467   : > { %p1328_p3 = pneg %p1327_p2  ;;  %p1334_p8 = por %p1333_p7, %p1332_p4 }
 0x469   : > { %p1335_p9 = pnand %p1334_p8, %p1328_p3 }
 0x4c2   : > { %v947_v6 = vpop.permute.xlu1 %946 }
 0x4c3   : > { %950 = vst.msk [vmem:[#allocation2] sm:$0xff] %vm949_vm6, %v947_v6 }
 0x4ca   : > { %v951_v7 = vld [vmem:[#allocation2] sm:$0xff] }
 0x4cb   : > { %952 = vst.msk [vmem:[%s339_s23] sm:$0xff] %vm370_vm1, %v951_v7 }
 0x4cc   : > { %1338 = shalt.err (!%p1335_p9)
}
 0x4cd   : > { %s1339_s20 = scalar_lea.hbm %s1628_s17, 128  ;;  %s1343_s22 = scalar_lea.hbm %s1679_s7, 768 }
 0x4ce   : > { %p1340_p10 = scmp.ne.s32.totalorder %s1628_s17, %s1339_s20  ;;  %p1344_p13 = scmp.lt.u32.totalorder %s1628_s17, %s1679_s7 }
 0x4cf   : > { %p1345_p0 = scmp.lt.u32.totalorder %s1343_s22, %s1339_s20  ;;  %p1347_p2 = scmp.lt.u32.totalorder %s1339_s20, %s1628_s17 }
 0x4d0   : > { %p1341_p11 = pnand %p1340_p10, %p1486_p5 }
 0x4d1   : > { %p1346_p1 = por %p1345_p0, %p1344_p13 }
 0x4d2   : > { %p1342_p12 = pneg %p1341_p11 }
 0x4d3   : > { %p1348_p3 = por %p1347_p2, %p1346_p1 }
 0x4d5   : > { %p1349_p4 = pnand %p1348_p3, %p1342_p12 }
 0x4d7   : > { %1352 = shalt.err (!%p1349_p4)
}
 0x4d8   : > { %1237 = dma.vmem_to_hbm [thread:$0]  (%p1486_p5), %s1630_s25, 128, %s1628_s17, %s954_s24  }
 0x4d9 PF: > { %p1248_p7 = scmp.ge.s32.totalorder %s1391_s30, 2  ;;  %s1000_s12 = sand.u32 1, %s1379_s27  }
 0x4da   : > { %s1001_s10 = scalar_lea.sflag [#allocation4], %s1000_s12 }
 0x4db   : > { %p1242_p8 = pnand %p1248_p7, %p1490_p6 }
 0x4dd   : > { %1370 = dma.done.wait (!%p1242_p8), %s1001_s10, 128  }
 0x4de   : > { %1372 = vsyncadd (!%p1242_p8), %s1001_s10, 4294967168  ;;  %s1010_s9 = scalar_lea.sflag [#allocation6], %s1000_s12 }
 0x4df   : > { %1374 = dma.done.wait (!%p1242_p8), %s1010_s9, 256  }
 0x4e0   : > { %1376 = vsyncadd (!%p1242_p8), %s1010_s9, 4294967040  ;;  %p22_p5 = scmp.ge.s32.totalorder %s1473_s11, 8   ;;  %s1683_s27 = smov %s1383_s28 }
 0x4e1   : > { %s1684_s28 = smov %s1387_s29  ;;  %s1685_s29 = smov %s1484_s14 }
 0x4e2   : > { %s1686_s30 = smov %s1473_s11  ;;  %24 = sbr.rel (!%p22_p5) target bundleno = 5 (0x5), region = 110 }
 0x4e9   :  { %1015 = vsyncpa [#allocation4], 1 }
 0x4ea   :  { %1017 = vsyncpa [#allocation4 + $0x1], 1 }
 0x4eb   :  { %1018 = vsyncpa [#allocation6], 1 }
 0x4ec   :  { %1020 = vsyncpa [#allocation6 + $0x1], 1 }

</bundles_post_ra>
